<compile_context>
chip_gen: v7x
topology: tpu7x:2x2x1
jax: 0.10.0
libtpu: 0.0.40
codegen_flags: <defaults>
</compile_context>

<pallas_src>
import functools

import jax
import jax.numpy as jnp
from jax.experimental import pallas as pl
from jax.experimental.pallas import tpu as pltpu


def _round_up(x, m):
    return ((x + m - 1) // m) * m


def _pick_tile(batch, tm_max=512):
    """Batch tile: <=tm_max rows, multiple of 8, avoids near-2x padding."""
    b8 = _round_up(batch, 8)
    if b8 <= tm_max:
        return b8
    n_tiles = -(-b8 // tm_max)                 # ceil(b8 / tm_max)
    return _round_up(-(-b8 // n_tiles), 8)     # balanced tile, 8-aligned


def dqn_kernel(x_ref, w1_ref, b1_ref, w2_ref, b2_ref, w3_ref, b3_ref, o_ref):
    num_actions = o_ref.shape[-1]
    # Cast x -> matmul dtype inside the kernel (hidden under the output DMA).
    x = x_ref[...].astype(w1_ref.dtype)
    # Layer 1: Linear(num_inputs, 128) + ReLU (f32 accumulate / elementwise).
    h1 = jnp.dot(x, w1_ref[...], preferred_element_type=jnp.float32)
    h1 = jnp.maximum(h1 + b1_ref[...], 0.0)
    # Layer 2: Linear(128, 128) + ReLU.
    h2 = jnp.dot(h1.astype(w2_ref.dtype), w2_ref[...],
                 preferred_element_type=jnp.float32)
    h2 = jnp.maximum(h2 + b2_ref[...], 0.0)
    # Layer 3: Linear(128, 128-padded) on the MXU; store only the real actions.
    out = jnp.dot(h2.astype(w3_ref.dtype), w3_ref[...],
                  preferred_element_type=jnp.float32)
    out = out + b3_ref[...]
    o_ref[...] = out[:, :num_actions].astype(o_ref.dtype)


def prepare_params(params, *, matmul_dtype=jnp.bfloat16):
    """One-time prep: pad w3/b3 output dim to 128 (MXU-friendly), cast weights
    to the matmul dtype, keep biases f32.  Returns (prepared_dict, num_actions).
    Call once and reuse; do NOT redo this per forward."""
    num_actions = params["w3"].shape[1]
    n_pad = _round_up(num_actions, 128)
    w3, b3 = params["w3"], params["b3"]
    if n_pad != num_actions:
        w3 = jnp.pad(w3, ((0, 0), (0, n_pad - num_actions)))
        b3 = jnp.pad(b3, ((0, 0), (0, n_pad - num_actions)))
    prep = {
        "w1": params["w1"].astype(matmul_dtype),
        "b1": params["b1"].astype(jnp.float32),
        "w2": params["w2"].astype(matmul_dtype),
        "b2": params["b2"].astype(jnp.float32),
        "w3": w3.astype(matmul_dtype),
        "b3": b3.astype(jnp.float32),
    }
    return prep, num_actions


@functools.partial(jax.jit, static_argnames=("num_actions", "tm_max"))
def dqn_forward(x, prep, num_actions, *, tm_max=512):
    """x: (B, num_inputs) float32. prep: output of prepare_params()."""
    B, num_inputs = x.shape
    hidden = prep["w1"].shape[1]
    n_pad = prep["w3"].shape[1]

    # --- Batch tiling (multiple grid steps -> pipelining + v7x 2-TC sharding).
    tm = _pick_tile(B, tm_max)
    b_pad = _round_up(B, tm)
    if b_pad != B:
        x = jnp.pad(x, ((0, b_pad - B), (0, 0)))
    grid = (b_pad // tm,)

    op_bytes = jnp.dtype(prep["w1"].dtype).itemsize
    flops = 2 * b_pad * (num_inputs * hidden + hidden * hidden + hidden * n_pad)
    bytes_accessed = (
        b_pad * num_inputs * 4                                       # x (f32)
        + (num_inputs * hidden + hidden * hidden + hidden * n_pad) * op_bytes
        + (2 * hidden + n_pad) * 4                                   # biases
        + b_pad * num_actions * 4                                    # narrow out
    )

    out = pl.pallas_call(
        dqn_kernel,
        out_shape=jax.ShapeDtypeStruct((b_pad, num_actions), jnp.float32),
        grid=grid,
        in_specs=[
            pl.BlockSpec((tm, num_inputs), lambda i: (i, 0)),       # x tile (f32)
            pl.BlockSpec((num_inputs, hidden), lambda i: (0, 0)),   # w1 (resident)
            pl.BlockSpec((1, hidden), lambda i: (0, 0)),            # b1
            pl.BlockSpec((hidden, hidden), lambda i: (0, 0)),       # w2
            pl.BlockSpec((1, hidden), lambda i: (0, 0)),            # b2
            pl.BlockSpec((hidden, n_pad), lambda i: (0, 0)),        # w3 (128-padded)
            pl.BlockSpec((1, n_pad), lambda i: (0, 0)),             # b3 (128-padded)
        ],
        out_specs=pl.BlockSpec((tm, num_actions), lambda i: (i, 0)),
        compiler_params=pltpu.CompilerParams(
            dimension_semantics=("parallel",),   # shard batch tiles across TCs
        ),
        cost_estimate=pl.CostEstimate(
            flops=flops, transcendentals=0, bytes_accessed=bytes_accessed
        ),
    )(x, prep["w1"], prep["b1"], prep["w2"], prep["b2"], prep["w3"], prep["b3"])

    return out[:B]


def init_params(key, num_inputs, num_actions, hidden=128):
    # Deterministic synthetic init (uniform, roughly PyTorch's kaiming-uniform
    # bounds). Biases kept as (1, dim) for 2-D TPU layout.
    ks = jax.random.split(key, 6)

    def lin(kw, kb, fan_in, fan_out):
        bound = 1.0 / jnp.sqrt(jnp.float32(fan_in))
        w = jax.random.uniform(kw, (fan_in, fan_out), jnp.float32, -bound, bound)
        b = jax.random.uniform(kb, (1, fan_out), jnp.float32, -bound, bound)
        return w, b

    w1, b1 = lin(ks[0], ks[1], num_inputs, hidden)
    w2, b2 = lin(ks[2], ks[3], hidden, hidden)
    w3, b3 = lin(ks[4], ks[5], hidden, num_actions)
    return {"w1": w1, "b1": b1, "w2": w2, "b2": b2, "w3": w3, "b3": b3}


# TODO(synk): DQN.act()'s epsilon-greedy branch (host-side python RNG) is not a
# kernel concern; argmax over the returned Q-values is done by the caller.

if __name__ == "__main__":
    key = jax.random.PRNGKey(0)
    k_params, k_x = jax.random.split(key)

    num_inputs = 8      # small state vector (CartPole-like would be 4)
    num_actions = 4
    batch = 8

    params = init_params(k_params, num_inputs, num_actions)
    x = jax.random.normal(k_x, (batch, num_inputs), jnp.float32)

    # Reference in plain JAX (same math as the nn.Sequential forward, f32).
    h1 = jnp.maximum(x @ params["w1"] + params["b1"], 0.0)
    h2 = jnp.maximum(h1 @ params["w2"] + params["b2"], 0.0)
    ref = h2 @ params["w3"] + params["b3"]

    # Exact-path check (f32 matmul operands).
    prep_f32, n_act = prepare_params(params, matmul_dtype=jnp.float32)
    out_f32 = jax.block_until_ready(dqn_forward(x, prep_f32, n_act))
    assert out_f32.shape == (batch, num_actions)
    assert jnp.allclose(out_f32, ref, atol=1e-5, rtol=1e-5)

    # Default fast path (bf16 MXU operands, f32 accumulation) -> loose tol.
    prep_bf16, n_act = prepare_params(params, matmul_dtype=jnp.bfloat16)
    out = jax.block_until_ready(dqn_forward(x, prep_bf16, n_act))
    assert out.shape == (batch, num_actions)
    assert jnp.allclose(out, ref, atol=2e-2, rtol=2e-2)

    print("KERNEL_OK")
</pallas_src>

<mosaic_0001>
module attributes {stable_mosaic.version = 11 : i64} {
  func.func @dqn_kernel(%arg0: i32, %arg1: memref<8x8xf32, #tpu.memory_space<vmem>>, %arg2: memref<8x128xf32, #tpu.memory_space<vmem>>, %arg3: memref<1x128xf32, #tpu.memory_space<vmem>>, %arg4: memref<128x128xf32, #tpu.memory_space<vmem>>, %arg5: memref<1x128xf32, #tpu.memory_space<vmem>>, %arg6: memref<128x128xf32, #tpu.memory_space<vmem>>, %arg7: memref<1x128xf32, #tpu.memory_space<vmem>>, %arg8: memref<8x4xf32, #tpu.memory_space<vmem>>) attributes {dimension_semantics = [#tpu.dimension_semantics<parallel>], iteration_bounds = array<i64: 1>, scalar_prefetch = 0 : i64, scratch_operands = 0 : i64, tpu.core_type = #tpu.core_type<tc>, window_params = [{transform_indices = @transform_0, window_bounds = array<i64: 8, 8>}, {pipeline_mode = #tpu.pipeline_mode<synchronous>, transform_indices = @transform_1, window_bounds = array<i64: 8, 128>}, {pipeline_mode = #tpu.pipeline_mode<synchronous>, transform_indices = @transform_2, window_bounds = array<i64: 1, 128>}, {pipeline_mode = #tpu.pipeline_mode<synchronous>, transform_indices = @transform_3, window_bounds = array<i64: 128, 128>}, {pipeline_mode = #tpu.pipeline_mode<synchronous>, transform_indices = @transform_4, window_bounds = array<i64: 1, 128>}, {pipeline_mode = #tpu.pipeline_mode<synchronous>, transform_indices = @transform_5, window_bounds = array<i64: 128, 128>}, {pipeline_mode = #tpu.pipeline_mode<synchronous>, transform_indices = @transform_6, window_bounds = array<i64: 1, 128>}, {transform_indices = @transform_7, window_bounds = array<i64: 8, 4>}]} {
    %c0 = arith.constant 0 : index
    %c0_0 = arith.constant 0 : index
    %0 = vector.load %arg1[%c0, %c0_0] : memref<8x8xf32, #tpu.memory_space<vmem>>, vector<8x8xf32>
    %c0_1 = arith.constant 0 : index
    %c0_2 = arith.constant 0 : index
    %1 = vector.load %arg2[%c0_1, %c0_2] : memref<8x128xf32, #tpu.memory_space<vmem>>, vector<8x128xf32>
    %cst = arith.constant dense<0.000000e+00> : vector<8x128xf32>
    %2 = tpu.matmul %0, %1, %cst {dimension_numbers = #tpu.dot_dimension_numbers<[1], [0], [0], [1], [0, 0, 1, 1], [], []>} : vector<8x8xf32>, vector<8x128xf32>, vector<8x128xf32> -> vector<8x128xf32>
    %c0_3 = arith.constant 0 : index
    %c0_4 = arith.constant 0 : index
    %3 = vector.load %arg3[%c0_3, %c0_4] : memref<1x128xf32, #tpu.memory_space<vmem>>, vector<1x128xf32>
    %4 = vector.broadcast %3 : vector<1x128xf32> to vector<8x128xf32>
    %5 = arith.addf %2, %4 : vector<8x128xf32>
    %cst_5 = arith.constant 0.000000e+00 : f32
    %6 = vector.broadcast %cst_5 : f32 to vector<8x128xf32>
    %7 = arith.maximumf %5, %6 : vector<8x128xf32>
    %c0_6 = arith.constant 0 : index
    %c0_7 = arith.constant 0 : index
    %8 = vector.load %arg4[%c0_6, %c0_7] : memref<128x128xf32, #tpu.memory_space<vmem>>, vector<128x128xf32>
    %cst_8 = arith.constant dense<0.000000e+00> : vector<8x128xf32>
    %9 = tpu.matmul %7, %8, %cst_8 {dimension_numbers = #tpu.dot_dimension_numbers<[1], [0], [0], [1], [0, 0, 1, 1], [], []>} : vector<8x128xf32>, vector<128x128xf32>, vector<8x128xf32> -> vector<8x128xf32>
    %c0_9 = arith.constant 0 : index
    %c0_10 = arith.constant 0 : index
    %10 = vector.load %arg5[%c0_9, %c0_10] : memref<1x128xf32, #tpu.memory_space<vmem>>, vector<1x128xf32>
    %11 = vector.broadcast %10 : vector<1x128xf32> to vector<8x128xf32>
    %12 = arith.addf %9, %11 : vector<8x128xf32>
    %cst_11 = arith.constant 0.000000e+00 : f32
    %13 = vector.broadcast %cst_11 : f32 to vector<8x128xf32>
    %14 = arith.maximumf %12, %13 : vector<8x128xf32>
    %c0_12 = arith.constant 0 : index
    %c0_13 = arith.constant 0 : index
    %15 = vector.load %arg6[%c0_12, %c0_13] : memref<128x128xf32, #tpu.memory_space<vmem>>, vector<128x128xf32>
    %cst_14 = arith.constant dense<0.000000e+00> : vector<8x128xf32>
    %16 = tpu.matmul %14, %15, %cst_14 {dimension_numbers = #tpu.dot_dimension_numbers<[1], [0], [0], [1], [0, 0, 1, 1], [], []>} : vector<8x128xf32>, vector<128x128xf32>, vector<8x128xf32> -> vector<8x128xf32>
    %c0_15 = arith.constant 0 : index
    %c0_16 = arith.constant 0 : index
    %17 = vector.load %arg7[%c0_15, %c0_16] : memref<1x128xf32, #tpu.memory_space<vmem>>, vector<1x128xf32>
    %18 = vector.broadcast %17 : vector<1x128xf32> to vector<8x128xf32>
    %19 = arith.addf %16, %18 : vector<8x128xf32>
    %20 = vector.extract_strided_slice %19 {offsets = [0, 0], sizes = [8, 4], strides = [1, 1]} : vector<8x128xf32> to vector<8x4xf32>
    %c0_17 = arith.constant 0 : index
    %c0_18 = arith.constant 0 : index
    %21 = vector.load %arg8[%c0_17, %c0_18] : memref<8x4xf32, #tpu.memory_space<vmem>>, vector<8x4xf32>
    tpu.vector_store %arg8[%c0_17, %c0_18], %20 {strides = array<i32>} : memref<8x4xf32, #tpu.memory_space<vmem>>, vector<8x4xf32>,
    return
  }
  func.func @transform_0(%arg0: i32) -> (i32, i32) {
    %c0_i32 = arith.constant 0 : i32
    %c0_i32_0 = arith.constant 0 : i32
    return %arg0, %c0_i32 : i32, i32
  }
  func.func @transform_1(%arg0: i32) -> (i32, i32) {
    %c0_i32 = arith.constant 0 : i32
    %c0_i32_0 = arith.constant 0 : i32
    %c0_i32_1 = arith.constant 0 : i32
    return %c0_i32, %c0_i32_0 : i32, i32
  }
  func.func @transform_2(%arg0: i32) -> (i32, i32) {
    %c0_i32 = arith.constant 0 : i32
    %c0_i32_0 = arith.constant 0 : i32
    %c0_i32_1 = arith.constant 0 : i32
    return %c0_i32, %c0_i32_0 : i32, i32
  }
  func.func @transform_3(%arg0: i32) -> (i32, i32) {
    %c0_i32 = arith.constant 0 : i32
    %c0_i32_0 = arith.constant 0 : i32
    %c0_i32_1 = arith.constant 0 : i32
    return %c0_i32, %c0_i32_0 : i32, i32
  }
  func.func @transform_4(%arg0: i32) -> (i32, i32) {
    %c0_i32 = arith.constant 0 : i32
    %c0_i32_0 = arith.constant 0 : i32
    %c0_i32_1 = arith.constant 0 : i32
    return %c0_i32, %c0_i32_0 : i32, i32
  }
  func.func @transform_5(%arg0: i32) -> (i32, i32) {
    %c0_i32 = arith.constant 0 : i32
    %c0_i32_0 = arith.constant 0 : i32
    %c0_i32_1 = arith.constant 0 : i32
    return %c0_i32, %c0_i32_0 : i32, i32
  }
  func.func @transform_6(%arg0: i32) -> (i32, i32) {
    %c0_i32 = arith.constant 0 : i32
    %c0_i32_0 = arith.constant 0 : i32
    %c0_i32_1 = arith.constant 0 : i32
    return %c0_i32, %c0_i32_0 : i32, i32
  }
  func.func @transform_7(%arg0: i32) -> (i32, i32) {
    %c0_i32 = arith.constant 0 : i32
    %c0_i32_0 = arith.constant 0 : i32
    return %arg0, %c0_i32 : i32, i32
  }
}

</mosaic_0001>

<bundles_post_ra>
// kernel: dqn_forward.1
= control target key start
LH: loop header
LB: loop body
LE: loop exit
PB: predicated region body
PF: predicated region fallthrough
CT: control target
= control target key end

     0   :  { %12 = vsyncpa [#allocation3], 0  ;;  %s709_s0 = inlined_call_operand.hbm [shape: f32[8,8], index: 0, kind: input, shape index: {}]   ;;  %s710_s1 = inlined_call_operand.vmem [shape: f32[8,128], index: 1, kind: input, shape index: {}]   ;;  %s711_s2 = inlined_call_operand.vmem [shape: f32[1,128], index: 2, kind: input, shape index: {}]   ;;  %s712_s3 = inlined_call_operand.hbm [shape: f32[128,128], index: 3, kind: input, shape index: {}]   ;;  %s713_s4 = inlined_call_operand.vmem [shape: f32[1,128], index: 4, kind: input, shape index: {}]   ;;  %s714_s5 = inlined_call_operand.hbm [shape: f32[128,128], index: 5, kind: input, shape index: {}]   ;;  %s715_s6 = inlined_call_operand.vmem [shape: f32[1,128], index: 6, kind: input, shape index: {}]   ;;  %s716_s7 = inlined_call_operand.vmem [shape: f32[8,4], index: 7, kind: output, shape index: {}]  }
   0x1   :  { %13 = vsyncpa [#allocation5], 0  ;;  %s585_s24 = smov [#allocation4]   ;;  %s515_s28 = scalar_lea.hbm %s712_s3, 2048 }
   0x2   :  { %s33_s25 = sshll.u32 %s585_s24, 4  ;;  %p516_p0 = scmp.ne.s32.totalorder %s712_s3, %s515_s28  ;;  %s34_s25 = int_to_ptr.vmem [resolvable:$true] %s33_s25 }
   0x3   :  { %p519_p1 = scmp.lt.u32.totalorder %s515_s28, %s712_s3 }
   0x5   :  { %p521_p2 = pnand %p519_p1, %p516_p0 }
   0x7   :  { %524 = shalt.err (!%p521_p2)
}
   0x8   :  { %s525_s10 = scalar_lea.vmem %s34_s25, 2048  ;;  %p530_p4 = scmp.lt.s32.totalorder %s34_s25, %s34_s25 }
   0x9   :  { %p526_p3 = scmp.ne.s32.totalorder %s34_s25, %s525_s10  ;;  %p531_p5 = scmp.lt.s32.totalorder %s525_s10, %s525_s10 }
   0xb   :  { %p532_p6 = por %p531_p5, %p530_p4 }
   0xd   :  { %p533_p7 = pnand %p532_p6, %p526_p3 }
   0xf   :  { %536 = shalt.err (!%p533_p7)
}
  0x10   :  { %s586_s11 = smov 128   ;;  %s587_s12 = smov 8  }
  0x11   :  { %39 = dma.hbm_to_vmem [thread:$0]  %s712_s3, 2048, %s34_s25, [#allocation5], %s586_s11, %s586_s11, %s587_s12  }
  0x12   :  { %s588_s15 = smov [#allocation2]   ;;  %s589_s17 = smov [#allocation6]  }
  0x13   :  { %s20_s16 = sshll.u32 %s588_s15, 4  ;;  %s47_s18 = sshll.u32 %s589_s17, 4  ;;  %s21_s16 = int_to_ptr.vmem [resolvable:$true] %s20_s16  ;;  %s48_s18 = int_to_ptr.vmem [resolvable:$true] %s47_s18 }
  0x14   :  { %s537_s21 = scalar_lea.hbm %s709_s0, 128 }
  0x15   :  { %p538_p8 = scmp.ne.s32.totalorder %s709_s0, %s537_s21  ;;  %p541_p9 = scmp.lt.u32.totalorder %s537_s21, %s709_s0 }
  0x17   :  { %p543_p10 = pnand %p541_p9, %p538_p8 }
  0x19   :  { %546 = shalt.err (!%p543_p10)
}
  0x1a   :  { %s547_s3 = scalar_lea.vmem %s21_s16, 128  ;;  %p552_p12 = scmp.lt.s32.totalorder %s21_s16, %s21_s16 }
  0x1b   :  { %p548_p11 = scmp.ne.s32.totalorder %s21_s16, %s547_s3  ;;  %p553_p13 = scmp.lt.s32.totalorder %s547_s3, %s547_s3 }
  0x1d   :  { %p554_p0 = por %p553_p13, %p552_p12 }
  0x1f   :  { %p555_p1 = pnand %p554_p0, %p548_p11 }
  0x21   :  { %558 = shalt.err (!%p555_p1)
}
  0x22   :  { %23 = dma.hbm_to_vmem [thread:$0]  %s709_s0, 128, %s21_s16, [#allocation3]  }
  0x23   :  { %s559_s30 = scalar_lea.hbm %s714_s5, 2048 }
  0x24   :  { %p560_p2 = scmp.ne.s32.totalorder %s714_s5, %s559_s30  ;;  %p563_p3 = scmp.lt.u32.totalorder %s559_s30, %s714_s5 }
  0x26   :  { %p565_p4 = pnand %p563_p3, %p560_p2 }
  0x28   :  { %568 = shalt.err (!%p565_p4)
}
  0x29   :  { %s569_s14 = scalar_lea.vmem %s48_s18, 2048  ;;  %p574_p6 = scmp.lt.s32.totalorder %s48_s18, %s48_s18 }
  0x2a   :  { %p570_p5 = scmp.ne.s32.totalorder %s48_s18, %s569_s14  ;;  %p575_p7 = scmp.lt.s32.totalorder %s569_s14, %s569_s14 }
  0x2c   :  { %p576_p8 = por %p575_p7, %p574_p6 }
  0x2e   :  { %p577_p9 = pnand %p576_p8, %p570_p5 }
  0x30   :  { %580 = shalt.err (!%p577_p9)
}
  0x31   :  { %53 = dma.hbm_to_vmem [thread:$0]  %s714_s5, 2048, %s48_s18, [#allocation5], %s586_s11, %s586_s11, %s587_s12  }
  0x32   :  { %581 = dma.done.wait [#allocation3], 128  }
  0x33   :  { %582 = vsyncadd [#allocation3], 4294967168 }
  0x34   :  { %583 = dma.done.wait [#allocation5], 4096  }
  0x35   :  { %584 = vsyncadd [#allocation5], 4294963200  ;;  %v590_v0 = vmov 0.0   ;;  %vm591_vm0 = vmmov 0   ;;  %v592_v1 = vmov 0.0|0.0   ;;  %vm74_vm1 = vcmask 64512  }
  0x36   :  { %384 = vmatprep.subr.mxu0 %v590_v0  ;;  %386 = vmatprep.mubr.msk.f32.mxu0 %vm591_vm0, %v590_v0  ;;  %v66_v2 = vld [vmem:[%s710_s1] sm:$0xff]  ;;  %v149_v4 = vld [vmem:[#allocation4] sm:$0xff]  ;;  %v150_v5 = vld [vmem:[#allocation4 + $0x8] sm:$0xff]  ;;  %vm336_vm2 = vcmask 31744  }
  0x37   :  { %459 = vmatprep.subr.bf16.mxu1 %v592_v1  ;;  %421 = vmatprep.mubr.msk.f32.mxu1 %vm591_vm0, %v590_v0  ;;  %v65_v3 = vld [vmem:[#allocation2] sm:$0xff]  ;;  %v151_v6 = vld [vmem:[#allocation4 + $0x10] sm:$0xff]  ;;  %v460_v8 = vpack.c.bf16 %v150_v5, %v149_v4  ;;  %v153_v10 = vld [vmem:[#allocation4 + $0x20] sm:$0xff] }
  0x38   :  { %385 = vmatpush3.msra.mxu0 %v66_v2  ;;  %v152_v7 = vld [vmem:[#allocation4 + $0x18] sm:$0xff]  ;;  %v154_v11 = vld [vmem:[#allocation4 + $0x28] sm:$0xff]  ;;  %v155_v13 = vld [vmem:[#allocation4 + $0x30] sm:$0xff] }
  0x39   :  { %387 = vmatmul.mubr.msk.f32.vlgmr.msra.gmra.mrb[0].mxu0 %vm74_vm1, %v65_v3  ;;  %483 = vmatprep.subr.bf16.mxu0 %v592_v1  ;;  %v463_v9 = vpack.c.bf16 %v152_v7, %v151_v6  ;;  %v466_v12 = vpack.c.bf16 %v154_v11, %v153_v10  ;;  %v156_v14 = vld [vmem:[#allocation4 + $0x38] sm:$0xff]  ;;  %v157_v16 = vld [vmem:[#allocation4 + $0x40] sm:$0xff]  ;;  %v158_v17 = vld [vmem:[#allocation4 + $0x48] sm:$0xff] }
  0x3a   :  { %456 = vmatprep.mubr.msk.f32.mxu0 %vm591_vm0, %v590_v0  ;;  %461 = vmatpush3.bf16.msra.mxu1 %v460_v8  ;;  %v469_v15 = vpack.c.bf16 %v156_v14, %v155_v13  ;;  %v472_v18 = vpack.c.bf16 %v158_v17, %v157_v16  ;;  %v159_v19 = vld [vmem:[#allocation4 + $0x50] sm:$0xff]  ;;  %v160_v20 = vld [vmem:[#allocation4 + $0x58] sm:$0xff]  ;;  %v161_v22 = vld [vmem:[#allocation4 + $0x60] sm:$0xff] }
  0x3b   :  { %462 = vmatprep.subr.bf16.mxu1 %v592_v1  ;;  %v475_v21 = vpack.c.bf16 %v160_v20, %v159_v19  ;;  %v162_v23 = vld [vmem:[#allocation4 + $0x68] sm:$0xff]  ;;  %v163_v25 = vld [vmem:[#allocation4 + $0x70] sm:$0xff]  ;;  %v164_v26 = vld [vmem:[#allocation4 + $0x78] sm:$0xff] }
  0x3c   :  { %v478_v24 = vpack.c.bf16 %v162_v23, %v161_v22  ;;  %v481_v27 = vpack.c.bf16 %v164_v26, %v163_v25  ;;  %v243_v28 = vld [vmem:[#allocation6] sm:$0xff]  ;;  %v244_v29 = vld [vmem:[#allocation6 + $0x8] sm:$0xff]  ;;  %v245_v30 = vld [vmem:[#allocation6 + $0x10] sm:$0xff] }
  0x3d   :  { %v484_v31 = vpack.c.bf16 %v244_v29, %v243_v28  ;;  %v246_v32 = vld [vmem:[#allocation6 + $0x18] sm:$0xff]  ;;  %v247_v34 = vld [vmem:[#allocation6 + $0x20] sm:$0xff]  ;;  %v248_v35 = vld [vmem:[#allocation6 + $0x28] sm:$0xff] }
  0x3e   :  { %464 = vmatpush3.bf16.msra.mxu1 %v463_v9  ;;  %v487_v33 = vpack.c.bf16 %v246_v32, %v245_v30  ;;  %v490_v36 = vpack.c.bf16 %v248_v35, %v247_v34  ;;  %v249_v37 = vld [vmem:[#allocation6 + $0x30] sm:$0xff]  ;;  %v250_v38 = vld [vmem:[#allocation6 + $0x38] sm:$0xff]  ;;  %v251_v40 = vld [vmem:[#allocation6 + $0x40] sm:$0xff] }
  0x3f   :  { %465 = vmatprep.subr.bf16.mxu1 %v592_v1  ;;  %485 = vmatpush3.bf16.msra.mxu0 %v484_v31  ;;  %v493_v39 = vpack.c.bf16 %v250_v38, %v249_v37  ;;  %v252_v41 = vld [vmem:[#allocation6 + $0x48] sm:$0xff]  ;;  %v253_v43 = vld [vmem:[#allocation6 + $0x50] sm:$0xff]  ;;  %v254_v44 = vld [vmem:[#allocation6 + $0x58] sm:$0xff] }
  0x40   :  { %486 = vmatprep.subr.bf16.mxu0 %v592_v1  ;;  %v496_v42 = vpack.c.bf16 %v252_v41, %v251_v40  ;;  %v499_v45 = vpack.c.bf16 %v254_v44, %v253_v43  ;;  %v255_v46 = vld [vmem:[#allocation6 + $0x60] sm:$0xff]  ;;  %v256_v47 = vld [vmem:[#allocation6 + $0x68] sm:$0xff]  ;;  %v344_v49 = vld [vmem:[%s711_s2] ss:$0 sm:$0xff] }
  0x41   :  { %v502_v48 = vpack.c.bf16 %v256_v47, %v255_v46  ;;  %v257_v54 = vld [vmem:[#allocation6 + $0x70] sm:$0xff]  ;;  %v258_v55 = vld [vmem:[#allocation6 + $0x78] sm:$0xff] }
  0x42   :  { %467 = vmatpush3.bf16.msra.mxu1 %v466_v12  ;;  %v505_v56 = vpack.c.bf16 %v258_v55, %v257_v54  ;;  %v346_v57 = vld [vmem:[%s713_s4] ss:$0 sm:$0xff] }
  0x43   :  { %468 = vmatprep.subr.bf16.mxu1 %v592_v1  ;;  %488 = vmatpush3.bf16.msra.mxu0 %v487_v33  ;;  %v347_v62 = vld [vmem:[%s715_s6] ss:$0 sm:$0xff] }
  0x44   :  { %489 = vmatprep.subr.bf16.mxu0 %v592_v1 }
  0x46   :  { %470 = vmatpush3.bf16.msra.mxu1 %v469_v15 }
  0x47   :  { %471 = vmatprep.subr.bf16.mxu1 %v592_v1  ;;  %491 = vmatpush3.bf16.msra.mxu0 %v490_v36 }
  0x48   :  { %492 = vmatprep.subr.bf16.mxu0 %v592_v1 }
  0x4a   :  { %473 = vmatpush3.bf16.msra.mxu1 %v472_v18 }
  0x4b   :  { %474 = vmatprep.subr.bf16.mxu1 %v592_v1  ;;  %494 = vmatpush3.bf16.msra.mxu0 %v493_v39 }
  0x4c   :  { %495 = vmatprep.subr.bf16.mxu0 %v592_v1 }
  0x4e   :  { %476 = vmatpush3.bf16.msra.mxu1 %v475_v21 }
  0x4f   :  { %477 = vmatprep.subr.bf16.mxu1 %v592_v1  ;;  %497 = vmatpush3.bf16.msra.mxu0 %v496_v42 }
  0x50   :  { %498 = vmatprep.subr.bf16.mxu0 %v592_v1 }
  0x52   :  { %479 = vmatpush3.bf16.msra.mxu1 %v478_v24 }
  0x53   :  { %480 = vmatprep.subr.bf16.mxu1 %v592_v1  ;;  %500 = vmatpush3.bf16.msra.mxu0 %v499_v45 }
  0x54   :  { %501 = vmatprep.subr.bf16.mxu0 %v592_v1 }
  0x56   :  { %482 = vmatpush3.bf16.msra.mxu1 %v481_v27 }
  0x57   :  { %503 = vmatpush3.bf16.msra.mxu0 %v502_v48 }
  0x58   :  { %504 = vmatprep.subr.bf16.mxu0 %v592_v1 }
  0x5b   :  { %506 = vmatpush3.bf16.msra.mxu0 %v505_v56 }
 0x10c   :  { %v144_v50 = vpop.f32.mrb[0].mxu0 }
 0x10d   :  { %v145_v51 = vadd.f32 %v344_v49, %v144_v50  ;;  %v388_v52 = vpop.f32.mrb[1].mxu0 }
 0x10f   :  { %v148_v53 = vmax.f32 %v145_v51, 0.0 }
 0x111   :  { %422 = vmatmul.mubr.f32.vlgmr.msra.gmra.mrb[0].mxu1 %v148_v53 }
 0x1e4   :  { %v238_v58 = vpop.f32.mrb[0].mxu1 }
 0x1e5   :  { %v239_v59 = vadd.f32 %v346_v57, %v238_v58  ;;  %v423_v60 = vpop.f32.mrb[1].mxu1 }
 0x1e7   :  { %v242_v61 = vmax.f32 %v239_v59, 0.0 }
 0x1e9   :  { %457 = vmatmul.mubr.f32.vlgmr.msra.gmra.mrb[2].mxu0 %v242_v61 }
 0x2bc   :  { %v332_v63 = vpop.f32.mrb[2].mxu0 }
 0x2bd   :  { %v333_v0 = vadd.f32 %v347_v62, %v332_v63  ;;  %v458_v1 = vpop.f32.mrb[3].mxu0 }
 0x2bf   :  { %337 = vst.msk [vmem:[%s716_s7] sm:$0xff] %vm336_vm2, %v333_v0 }
 0x2c0   :  { %342 = vsyncpa [#allocation3], 1 }
 0x2c1   :  { %343 = vsyncpa [#allocation5], 1 }

</bundles_post_ra>
